<compile_context>
chip_gen: v6e
topology: v6e:2x2x1
jax: 0.10.0
libtpu: 0.0.40
codegen_flags: <defaults>
</compile_context>

<pallas_src>
import functools

import jax
import jax.numpy as jnp
from jax.experimental import pallas as pl
from jax.experimental.pallas import tpu as pltpu


def _mlp_kernel(x_ref,
                w1_ref, b1_ref,
                w2_ref, b2_ref,
                w3_ref, b3_ref,
                w4_ref, b4_ref,
                o_ref):
    # Layer 1: Linear + ReLU. MXU accumulates in f32; bias-add/ReLU stay f32.
    h = jnp.dot(x_ref[...], w1_ref[...], preferred_element_type=jnp.float32)
    h = jnp.maximum(h + b1_ref[...], 0.0)
    # Layer 2: Linear + ReLU (cast activations to the weight dtype so bf16
    # weights actually hit the bf16 MXU path; no-op for f32 weights).
    h = jnp.dot(h.astype(w2_ref.dtype), w2_ref[...],
                preferred_element_type=jnp.float32)
    h = jnp.maximum(h + b2_ref[...], 0.0)
    # Layer 3: Linear + ReLU
    h = jnp.dot(h.astype(w3_ref.dtype), w3_ref[...],
                preferred_element_type=jnp.float32)
    h = jnp.maximum(h + b3_ref[...], 0.0)
    # Layer 4: Linear + ReLU (ReLU on the last layer matches the PyTorch spec).
    h = jnp.dot(h.astype(w4_ref.dtype), w4_ref[...],
                preferred_element_type=jnp.float32)
    h = jnp.maximum(h + b4_ref[...], 0.0)
    o_ref[...] = h.astype(o_ref.dtype)


@functools.partial(jax.jit, static_argnames=("tile_m", "matmul_dtype"))
def relational_model_forward(x, params, tile_m=512, matmul_dtype=None):
    """x: [batch, n_relations, input_size] -> [batch, n_relations, output_size]."""
    batch, n_rel, input_size = x.shape
    w1, b1, w2, b2, w3, b3, w4, b4 = params
    hidden = w1.shape[1]
    output_size = w4.shape[1]
    out_dtype = x.dtype

    m = batch * n_rel
    x2d = x.reshape(m, input_size)

    # Optional low-precision matmul inputs (v6e/v7x): halves HBM traffic for x
    # and the weights; accumulation stays f32 inside the kernel.
    if matmul_dtype is not None:
        x2d = x2d.astype(matmul_dtype)
        w1, w2, w3, w4 = (w.astype(matmul_dtype) for w in (w1, w2, w3, w4))

    # Row tile: as big as possible (amortizes per-grid-step overhead), multiple
    # of 8 (f32 sublane), clamped so the block never exceeds M unnecessarily.
    # No padding copy of x: the ragged last block is masked by Pallas.
    tile = min(tile_m, max(8, (m // 8) * 8))
    grid = (pl.cdiv(m, tile),)

    weight_spec = lambda shape: pl.BlockSpec(shape, lambda i: (0, 0))

    flops = 2 * m * (input_size * hidden + 2 * hidden * hidden
                     + hidden * output_size)
    bytes_accessed = (
        x2d.size * x2d.dtype.itemsize
        + sum(a.size * a.dtype.itemsize
              for a in (w1, b1, w2, b2, w3, b3, w4, b4))
        + m * output_size * jnp.dtype(out_dtype).itemsize)

    out2d = pl.pallas_call(
        _mlp_kernel,
        out_shape=jax.ShapeDtypeStruct((m, output_size), out_dtype),
        grid_spec=pltpu.PrefetchScalarGridSpec(
            num_scalar_prefetch=0,
            grid=grid,
            in_specs=[
                pl.BlockSpec((tile, input_size), lambda i: (i, 0)),  # x tile
                weight_spec((input_size, hidden)),                   # w1
                weight_spec((1, hidden)),                            # b1
                weight_spec((hidden, hidden)),                       # w2
                weight_spec((1, hidden)),                            # b2
                weight_spec((hidden, hidden)),                       # w3
                weight_spec((1, hidden)),                            # b3
                weight_spec((hidden, output_size)),                  # w4
                weight_spec((1, output_size)),                       # b4
            ],
            out_specs=pl.BlockSpec((tile, output_size), lambda i: (i, 0)),
        ),
        compiler_params=pltpu.CompilerParams(
            dimension_semantics=("parallel",)),
        cost_estimate=pl.CostEstimate(
            flops=flops, transcendentals=0, bytes_accessed=bytes_accessed),
    )(x2d, w1, b1, w2, b2, w3, b3, w4, b4)

    return out2d.reshape(batch, n_rel, output_size)


def init_params(key, input_size, hidden_size, output_size, dtype=jnp.float32):
    """Deterministic synthetic parameters. Weights stored as [in, out]."""
    ks = jax.random.split(key, 8)

    def lin(kw, kb, fan_in, fan_out):
        bound = 1.0 / jnp.sqrt(fan_in)
        w = jax.random.uniform(kw, (fan_in, fan_out), dtype, -bound, bound)
        b = jax.random.uniform(kb, (1, fan_out), dtype, -bound, bound)
        return w, b

    w1, b1 = lin(ks[0], ks[1], input_size, hidden_size)
    w2, b2 = lin(ks[2], ks[3], hidden_size, hidden_size)
    w3, b3 = lin(ks[4], ks[5], hidden_size, hidden_size)
    w4, b4 = lin(ks[6], ks[7], hidden_size, output_size)
    return (w1, b1, w2, b2, w3, b3, w4, b4)


def _reference(x, params):
    w1, b1, w2, b2, w3, b3, w4, b4 = params
    b, r, d = x.shape
    h = x.reshape(-1, d)
    h = jnp.maximum(h @ w1 + b1, 0.0)
    h = jnp.maximum(h @ w2 + b2, 0.0)
    h = jnp.maximum(h @ w3 + b3, 0.0)
    h = jnp.maximum(h @ w4 + b4, 0.0)
    return h.reshape(b, r, w4.shape[1])


if __name__ == "__main__":
    key = jax.random.PRNGKey(0)
    k_x, k_p = jax.random.split(key)

    batch, n_relations = 2, 8
    input_size, hidden_size, output_size = 16, 32, 8

    x = jax.random.normal(k_x, (batch, n_relations, input_size), jnp.float32)
    params = init_params(k_p, input_size, hidden_size, output_size)
    ref = _reference(x, params)

    # f32 path.
    out = jax.block_until_ready(relational_model_forward(x, params))
    assert out.shape == (batch, n_relations, output_size)
    assert jnp.allclose(out, ref, atol=1e-5, rtol=1e-5)

    # Ragged-M path (M = 21 not a multiple of the 16-row tile): exercises the
    # no-padding masked last block.
    x_rag = jax.random.normal(k_x, (3, 7, input_size), jnp.float32)
    out_rag = jax.block_until_ready(
        relational_model_forward(x_rag, params, tile_m=16))
    assert jnp.allclose(out_rag, _reference(x_rag, params),
                        atol=1e-5, rtol=1e-5)

    # bf16 matmul-input path (v6e/v7x perf option); f32 accumulation, so only
    # input rounding differs -> loose tolerance vs. the f32 reference.
    out_bf16 = jax.block_until_ready(
        relational_model_forward(x, params, matmul_dtype=jnp.bfloat16))
    assert jnp.allclose(out_bf16, ref, atol=5e-2, rtol=5e-2)

    print("KERNEL_OK")
</pallas_src>

<mosaic_0001>
module attributes {stable_mosaic.version = 11 : i64} {
  func.func @_mlp_kernel(%arg0: i32, %arg1: memref<16x16xf32, #tpu.memory_space<vmem>>, %arg2: memref<16x32xf32, #tpu.memory_space<vmem>>, %arg3: memref<1x32xf32, #tpu.memory_space<vmem>>, %arg4: memref<32x32xf32, #tpu.memory_space<vmem>>, %arg5: memref<1x32xf32, #tpu.memory_space<vmem>>, %arg6: memref<32x32xf32, #tpu.memory_space<vmem>>, %arg7: memref<1x32xf32, #tpu.memory_space<vmem>>, %arg8: memref<32x8xf32, #tpu.memory_space<vmem>>, %arg9: memref<1x8xf32, #tpu.memory_space<vmem>>, %arg10: memref<16x8xf32, #tpu.memory_space<vmem>>) attributes {dimension_semantics = [#tpu.dimension_semantics<parallel>], iteration_bounds = array<i64: 1>, scalar_prefetch = 0 : i64, scratch_operands = 0 : i64, tpu.core_type = #tpu.core_type<tc>, window_params = [{transform_indices = @transform_0, window_bounds = array<i64: 16, 16>}, {pipeline_mode = #tpu.pipeline_mode<synchronous>, transform_indices = @transform_1, window_bounds = array<i64: 16, 32>}, {pipeline_mode = #tpu.pipeline_mode<synchronous>, transform_indices = @transform_2, window_bounds = array<i64: 1, 32>}, {pipeline_mode = #tpu.pipeline_mode<synchronous>, transform_indices = @transform_3, window_bounds = array<i64: 32, 32>}, {pipeline_mode = #tpu.pipeline_mode<synchronous>, transform_indices = @transform_4, window_bounds = array<i64: 1, 32>}, {pipeline_mode = #tpu.pipeline_mode<synchronous>, transform_indices = @transform_5, window_bounds = array<i64: 32, 32>}, {pipeline_mode = #tpu.pipeline_mode<synchronous>, transform_indices = @transform_6, window_bounds = array<i64: 1, 32>}, {pipeline_mode = #tpu.pipeline_mode<synchronous>, transform_indices = @transform_7, window_bounds = array<i64: 32, 8>}, {pipeline_mode = #tpu.pipeline_mode<synchronous>, transform_indices = @transform_8, window_bounds = array<i64: 1, 8>}, {transform_indices = @transform_9, window_bounds = array<i64: 16, 8>}]} {
    %c0 = arith.constant 0 : index
    %c0_0 = arith.constant 0 : index
    %0 = vector.load %arg1[%c0, %c0_0] : memref<16x16xf32, #tpu.memory_space<vmem>>, vector<16x16xf32>
    %c0_1 = arith.constant 0 : index
    %c0_2 = arith.constant 0 : index
    %1 = vector.load %arg2[%c0_1, %c0_2] : memref<16x32xf32, #tpu.memory_space<vmem>>, vector<16x32xf32>
    %cst = arith.constant dense<0.000000e+00> : vector<16x32xf32>
    %2 = tpu.matmul %0, %1, %cst {dimension_numbers = #tpu.dot_dimension_numbers<[1], [0], [0], [1], [0, 0, 1, 1], [], []>} : vector<16x16xf32>, vector<16x32xf32>, vector<16x32xf32> -> vector<16x32xf32>
    %c0_3 = arith.constant 0 : index
    %c0_4 = arith.constant 0 : index
    %3 = vector.load %arg3[%c0_3, %c0_4] : memref<1x32xf32, #tpu.memory_space<vmem>>, vector<1x32xf32>
    %4 = vector.broadcast %3 : vector<1x32xf32> to vector<16x32xf32>
    %5 = arith.addf %2, %4 : vector<16x32xf32>
    %cst_5 = arith.constant 0.000000e+00 : f32
    %6 = vector.broadcast %cst_5 : f32 to vector<16x32xf32>
    %7 = arith.maximumf %5, %6 : vector<16x32xf32>
    %c0_6 = arith.constant 0 : index
    %c0_7 = arith.constant 0 : index
    %8 = vector.load %arg4[%c0_6, %c0_7] : memref<32x32xf32, #tpu.memory_space<vmem>>, vector<32x32xf32>
    %cst_8 = arith.constant dense<0.000000e+00> : vector<16x32xf32>
    %9 = tpu.matmul %7, %8, %cst_8 {dimension_numbers = #tpu.dot_dimension_numbers<[1], [0], [0], [1], [0, 0, 1, 1], [], []>} : vector<16x32xf32>, vector<32x32xf32>, vector<16x32xf32> -> vector<16x32xf32>
    %c0_9 = arith.constant 0 : index
    %c0_10 = arith.constant 0 : index
    %10 = vector.load %arg5[%c0_9, %c0_10] : memref<1x32xf32, #tpu.memory_space<vmem>>, vector<1x32xf32>
    %11 = vector.broadcast %10 : vector<1x32xf32> to vector<16x32xf32>
    %12 = arith.addf %9, %11 : vector<16x32xf32>
    %cst_11 = arith.constant 0.000000e+00 : f32
    %13 = vector.broadcast %cst_11 : f32 to vector<16x32xf32>
    %14 = arith.maximumf %12, %13 : vector<16x32xf32>
    %c0_12 = arith.constant 0 : index
    %c0_13 = arith.constant 0 : index
    %15 = vector.load %arg6[%c0_12, %c0_13] : memref<32x32xf32, #tpu.memory_space<vmem>>, vector<32x32xf32>
    %cst_14 = arith.constant dense<0.000000e+00> : vector<16x32xf32>
    %16 = tpu.matmul %14, %15, %cst_14 {dimension_numbers = #tpu.dot_dimension_numbers<[1], [0], [0], [1], [0, 0, 1, 1], [], []>} : vector<16x32xf32>, vector<32x32xf32>, vector<16x32xf32> -> vector<16x32xf32>
    %c0_15 = arith.constant 0 : index
    %c0_16 = arith.constant 0 : index
    %17 = vector.load %arg7[%c0_15, %c0_16] : memref<1x32xf32, #tpu.memory_space<vmem>>, vector<1x32xf32>
    %18 = vector.broadcast %17 : vector<1x32xf32> to vector<16x32xf32>
    %19 = arith.addf %16, %18 : vector<16x32xf32>
    %cst_17 = arith.constant 0.000000e+00 : f32
    %20 = vector.broadcast %cst_17 : f32 to vector<16x32xf32>
    %21 = arith.maximumf %19, %20 : vector<16x32xf32>
    %c0_18 = arith.constant 0 : index
    %c0_19 = arith.constant 0 : index
    %22 = vector.load %arg8[%c0_18, %c0_19] : memref<32x8xf32, #tpu.memory_space<vmem>>, vector<32x8xf32>
    %cst_20 = arith.constant dense<0.000000e+00> : vector<16x8xf32>
    %23 = tpu.matmul %21, %22, %cst_20 {dimension_numbers = #tpu.dot_dimension_numbers<[1], [0], [0], [1], [0, 0, 1, 1], [], []>} : vector<16x32xf32>, vector<32x8xf32>, vector<16x8xf32> -> vector<16x8xf32>
    %c0_21 = arith.constant 0 : index
    %c0_22 = arith.constant 0 : index
    %24 = vector.load %arg9[%c0_21, %c0_22] : memref<1x8xf32, #tpu.memory_space<vmem>>, vector<1x8xf32>
    %25 = vector.broadcast %24 : vector<1x8xf32> to vector<16x8xf32>
    %26 = arith.addf %23, %25 : vector<16x8xf32>
    %cst_23 = arith.constant 0.000000e+00 : f32
    %27 = vector.broadcast %cst_23 : f32 to vector<16x8xf32>
    %28 = arith.maximumf %26, %27 : vector<16x8xf32>
    %c0_24 = arith.constant 0 : index
    %c0_25 = arith.constant 0 : index
    %29 = vector.load %arg10[%c0_24, %c0_25] : memref<16x8xf32, #tpu.memory_space<vmem>>, vector<16x8xf32>
    tpu.vector_store %arg10[%c0_24, %c0_25], %28 {strides = array<i32>} : memref<16x8xf32, #tpu.memory_space<vmem>>, vector<16x8xf32>,
    return
  }
  func.func @transform_0(%arg0: i32) -> (i32, i32) {
    %c0_i32 = arith.constant 0 : i32
    %c0_i32_0 = arith.constant 0 : i32
    return %arg0, %c0_i32 : i32, i32
  }
  func.func @transform_1(%arg0: i32) -> (i32, i32) {
    %c0_i32 = arith.constant 0 : i32
    %c0_i32_0 = arith.constant 0 : i32
    %c0_i32_1 = arith.constant 0 : i32
    return %c0_i32, %c0_i32_0 : i32, i32
  }
  func.func @transform_2(%arg0: i32) -> (i32, i32) {
    %c0_i32 = arith.constant 0 : i32
    %c0_i32_0 = arith.constant 0 : i32
    %c0_i32_1 = arith.constant 0 : i32
    return %c0_i32, %c0_i32_0 : i32, i32
  }
  func.func @transform_3(%arg0: i32) -> (i32, i32) {
    %c0_i32 = arith.constant 0 : i32
    %c0_i32_0 = arith.constant 0 : i32
    %c0_i32_1 = arith.constant 0 : i32
    return %c0_i32, %c0_i32_0 : i32, i32
  }
  func.func @transform_4(%arg0: i32) -> (i32, i32) {
    %c0_i32 = arith.constant 0 : i32
    %c0_i32_0 = arith.constant 0 : i32
    %c0_i32_1 = arith.constant 0 : i32
    return %c0_i32, %c0_i32_0 : i32, i32
  }
  func.func @transform_5(%arg0: i32) -> (i32, i32) {
    %c0_i32 = arith.constant 0 : i32
    %c0_i32_0 = arith.constant 0 : i32
    %c0_i32_1 = arith.constant 0 : i32
    return %c0_i32, %c0_i32_0 : i32, i32
  }
  func.func @transform_6(%arg0: i32) -> (i32, i32) {
    %c0_i32 = arith.constant 0 : i32
    %c0_i32_0 = arith.constant 0 : i32
    %c0_i32_1 = arith.constant 0 : i32
    return %c0_i32, %c0_i32_0 : i32, i32
  }
  func.func @transform_7(%arg0: i32) -> (i32, i32) {
    %c0_i32 = arith.constant 0 : i32
    %c0_i32_0 = arith.constant 0 : i32
    %c0_i32_1 = arith.constant 0 : i32
    return %c0_i32, %c0_i32_0 : i32, i32
  }
  func.func @transform_8(%arg0: i32) -> (i32, i32) {
    %c0_i32 = arith.constant 0 : i32
    %c0_i32_0 = arith.constant 0 : i32
    %c0_i32_1 = arith.constant 0 : i32
    return %c0_i32, %c0_i32_0 : i32, i32
  }
  func.func @transform_9(%arg0: i32) -> (i32, i32) {
    %c0_i32 = arith.constant 0 : i32
    %c0_i32_0 = arith.constant 0 : i32
    return %arg0, %c0_i32 : i32, i32
  }
}

</mosaic_0001>

<bundles_post_ra>
// kernel: relational_model_forward.1
= control target key start
LH: loop header
LB: loop body
LE: loop exit
PB: predicated region body
PF: predicated region fallthrough
CT: control target
= control target key end

     0   :  { %14 = vsyncpa [#allocation3], 0  ;;  %s761_s0 = inlined_call_operand.hbm [shape: f32[16,16], index: 0, kind: input, shape index: {}]   ;;  %s762_s1 = inlined_call_operand.hbm [shape: f32[16,32], index: 1, kind: input, shape index: {}]   ;;  %s763_s2 = inlined_call_operand.vmem [shape: f32[1,32], index: 2, kind: input, shape index: {}]   ;;  %s764_s3 = inlined_call_operand.vmem [shape: f32[32,32], index: 3, kind: input, shape index: {}]   ;;  %s765_s4 = inlined_call_operand.vmem [shape: f32[1,32], index: 4, kind: input, shape index: {}]   ;;  %s766_s5 = inlined_call_operand.hbm [shape: f32[32,32], index: 5, kind: input, shape index: {}]   ;;  %s767_s6 = inlined_call_operand.vmem [shape: f32[1,32], index: 6, kind: input, shape index: {}]   ;;  %s768_s7 = inlined_call_operand.vmem [shape: f32[32,8], index: 7, kind: input, shape index: {}]   ;;  %s769_s8 = inlined_call_operand.vmem [shape: f32[1,8], index: 8, kind: input, shape index: {}]   ;;  %s770_s9 = inlined_call_operand.hbm [shape: f32[16,8], index: 9, kind: output, shape index: {}]  }
   0x1   :  { %15 = vsyncpa [#allocation6], 0 }
   0x2   :  { %16 = vsyncpa [#allocation4], 0  ;;  %s639_s30 = smov [#allocation5]   ;;  %s640_s11 = smov [#allocation2]  }
   0x3   :  { %s34_s10 = sshll.u32 %s639_s30, 4  ;;  %s22_s12 = sshll.u32 %s640_s11, 4  ;;  %s35_s10 = int_to_ptr.vmem [resolvable:$true] %s34_s10  ;;  %s23_s12 = int_to_ptr.vmem [resolvable:$true] %s22_s12 }
   0x4   :  { %s561_s13 = scalar_lea.vmem %s35_s10, 256  ;;  %p566_p1 = scmp.lt.s32.totalorder %s35_s10, %s35_s10 }
   0x5   :  { %p562_p0 = scmp.ne.s32.totalorder %s35_s10, %s561_s13  ;;  %p567_p2 = scmp.lt.s32.totalorder %s561_s13, %s561_s13 }
   0x7   :  { %p568_p3 = por %p567_p2, %p566_p1 }
   0x9   :  { %p569_p4 = pnand %p568_p3, %p562_p0 }
   0xb   :  { %572 = shalt.err (!%p569_p4)
}
   0xc   :  { %s641_s14 = smov 128   ;;  %s642_s15 = smov 8  }
   0xd   :  { %40 = dma.hbm_to_vmem [thread:$0]  %s762_s1, 256, %s35_s10, [#allocation6], %s641_s14, %s641_s14, %s642_s15  }
   0xe   :  { %s581_s18 = scalar_lea.vmem %s23_s12, 256  ;;  %p586_p6 = scmp.lt.s32.totalorder %s23_s12, %s23_s12 }
   0xf   :  { %p582_p5 = scmp.ne.s32.totalorder %s23_s12, %s581_s18  ;;  %p587_p7 = scmp.lt.s32.totalorder %s581_s18, %s581_s18 }
  0x11   :  { %p588_p8 = por %p587_p7, %p586_p6 }
  0x13   :  { %p589_p9 = pnand %p588_p8, %p582_p5 }
  0x15   :  { %592 = shalt.err (!%p589_p9)
}
  0x16   :  { %28 = dma.hbm_to_vmem [thread:$0]  %s761_s0, 256, %s23_s12, [#allocation3], %s641_s14, %s641_s14, %s642_s15  }
  0x17   :  { %s643_s21 = smov [#allocation7]  }
  0x18   :  { %s52_s22 = sshll.u32 %s643_s21, 4  ;;  %s53_s22 = int_to_ptr.vmem [resolvable:$true] %s52_s22 }
  0x19   :  { %s601_s23 = scalar_lea.vmem %s53_s22, 512  ;;  %p606_p11 = scmp.lt.s32.totalorder %s53_s22, %s53_s22 }
  0x1a   :  { %p602_p10 = scmp.ne.s32.totalorder %s53_s22, %s601_s23  ;;  %p607_p12 = scmp.lt.s32.totalorder %s601_s23, %s601_s23 }
  0x1c   :  { %p608_p13 = por %p607_p12, %p606_p11 }
  0x1e   :  { %p609_p0 = pnand %p608_p13, %p602_p10 }
  0x20   :  { %612 = shalt.err (!%p609_p0)
}
  0x21   :  { %58 = dma.hbm_to_vmem [thread:$0]  %s766_s5, 512, %s53_s22, [#allocation6], %s641_s14, %s641_s14, %s642_s15  }
  0x22   :  { %633 = dma.done.wait [#allocation3], 256  }
  0x23   :  { %634 = vsyncadd [#allocation3], 4294967040 }
  0x24   :  { %635 = dma.done.wait [#allocation6], 768  }
  0x25   :  { %636 = vsyncadd [#allocation6], 4294966528  ;;  %vm85_vm0 = vcmask 130048   ;;  %v77_v0 = vld [vmem:[#allocation5 + $0x8] sm:$0xff]  ;;  %v76_v1 = vld [vmem:[#allocation5] sm:$0xff]  ;;  %vm180_vm1 = vcmask 261120  }
  0x26   :  { %v74_v2 = vld [vmem:[#allocation2] sm:$0xff]  ;;  %507 = vmatprep.subr.mxu0 %v77_v0  ;;  %v75_v3 = vld [vmem:[#allocation2 + $0x8] sm:$0xff]  ;;  %v172_v4 = vld [vmem:[%s764_s3 + $0x18] sm:$0xff]  ;;  %vm452_vm2 = vcmask 64512  }
  0x27   :  { %511 = vmatprep.mubr.msk.f32.mxu0 %vm85_vm0, %v74_v2  ;;  %508 = vmatpush3.msra.mxu0 %v77_v0  ;;  %v171_v5 = vld [vmem:[%s764_s3 + $0x10] sm:$0xff]  ;;  %v170_v6 = vld [vmem:[%s764_s3 + $0x8] sm:$0xff]  ;;  %v169_v7 = vld [vmem:[%s764_s3] sm:$0xff] }
  0x28   :  { %509 = vmatprep.subr.mxu0 %v76_v1  ;;  %514 = vmatprep.subr.mxu1 %v172_v4  ;;  %v473_v8 = vld [vmem:[%s763_s2] ss:$0 sm:$0xff]  ;;  %v267_v15 = vld [vmem:[#allocation7 + $0x18] sm:$0xff]  ;;  %v266_v16 = vld [vmem:[#allocation7 + $0x10] sm:$0xff] }
  0x29   :  { %510 = vmatpush3.msra.mxu0 %v76_v1  ;;  %515 = vmatpush3.msra.mxu1 %v172_v4  ;;  %v265_v17 = vld [vmem:[#allocation7 + $0x8] sm:$0xff]  ;;  %v264_v18 = vld [vmem:[#allocation7] sm:$0xff]  ;;  %v361_v26 = vld [vmem:[%s768_s7 + $0x18] sm:$0xff] }
  0x2a   :  { %512 = vmatmul.mubr.msk.f32.vlgmr.msra.gmra.mxu0 %vm85_vm0, %v75_v3  ;;  %516 = vmatprep.subr.mxu1 %v171_v5  ;;  %v476_v19 = vld [vmem:[%s765_s4] ss:$0 sm:$0xff]  ;;  %v360_v27 = vld [vmem:[%s768_s7 + $0x10] sm:$0xff]  ;;  %v359_v28 = vld [vmem:[%s768_s7 + $0x8] sm:$0xff] }
  0x2b   :  { %517 = vmatpush3.msra.mxu1 %v171_v5  ;;  %525 = vmatprep.subr.mxu0 %v267_v15  ;;  %v358_v29 = vld [vmem:[%s768_s7] sm:$0xff]  ;;  %s644_s7 = smov [#allocation8]  }
  0x2c   :  { %518 = vmatprep.subr.mxu1 %v170_v6  ;;  %526 = vmatpush3.msra.mxu0 %v267_v15  ;;  %v479_v30 = vld [vmem:[%s767_s6] ss:$0 sm:$0xff]  ;;  %s460_s6 = sshll.u32 %s644_s7, 4  ;;  %s461_s6 = int_to_ptr.vmem [resolvable:$true] %s460_s6 }
  0x2d   :  { %519 = vmatpush3.msra.mxu1 %v170_v6  ;;  %527 = vmatprep.subr.mxu0 %v266_v16  ;;  %v482_v37 = vld [vmem:[%s769_s8] ss:$0 sm:$0xff]  ;;  %s613_s24 = scalar_lea.vmem %s461_s6, 256  ;;  %p618_p2 = scmp.lt.s32.totalorder %s461_s6, %s461_s6 }
  0x2e   :  { %520 = vmatprep.subr.mxu1 %v169_v7  ;;  %528 = vmatpush3.msra.mxu0 %v266_v16  ;;  %p614_p1 = scmp.ne.s32.totalorder %s461_s6, %s613_s24  ;;  %p619_p3 = scmp.lt.s32.totalorder %s613_s24, %s613_s24 }
  0x2f   :  { %521 = vmatpush3.msra.mxu1 %v169_v7  ;;  %529 = vmatprep.subr.mxu0 %v265_v17 }
  0x30   :  { %530 = vmatpush3.msra.mxu0 %v265_v17  ;;  %536 = vmatprep.subr.mxu1 %v361_v26  ;;  %p620_p4 = por %p619_p3, %p618_p2 }
  0x31   :  { %531 = vmatprep.subr.mxu0 %v264_v18 }
  0x32   :  { %532 = vmatpush3.msra.mxu0 %v264_v18  ;;  %p621_p5 = pnand %p620_p4, %p614_p1 }
  0xea   :  { %v513_v9 = vpop.f32.mrf.mxu0 }
  0xeb   :  { %v164_v10 = vadd.f32 %v513_v9, %v473_v8 }
  0xec   :  { %v158_v11 = vpop.f32.mrf.mxu0 }
  0xed   :  { %v159_v12 = vadd.f32 %v473_v8, %v158_v11  ;;  %v168_v14 = vmax.f32 %v164_v10, 0.0 }
  0xef   :  { %v167_v13 = vmax.f32 %v159_v12, 0.0 }
  0xf1   :  { %522 = vmatprep.mubr.msk.f32.mxu1 %vm180_vm1, %v167_v13 }
  0xf2   :  { %523 = vmatmul.mubr.msk.f32.vlgmr.msra.gmra.mxu1 %vm180_vm1, %v168_v14 }
  0xf3   :  { %537 = vmatpush3.msra.mxu1 %v361_v26 }
  0xf4   :  { %538 = vmatprep.subr.mxu1 %v360_v27 }
  0xf5   :  { %539 = vmatpush3.msra.mxu1 %v360_v27 }
  0xf6   :  { %540 = vmatprep.subr.mxu1 %v359_v28 }
  0xf7   :  { %541 = vmatpush3.msra.mxu1 %v359_v28 }
  0xf8   :  { %542 = vmatprep.subr.mxu1 %v358_v29 }
  0xf9   :  { %543 = vmatpush3.msra.mxu1 %v358_v29 }
 0x1b2   :  { %v524_v20 = vpop.f32.mrf.mxu1 }
 0x1b3   :  { %v259_v21 = vadd.f32 %v524_v20, %v476_v19 }
 0x1b4   :  { %v253_v22 = vpop.f32.mrf.mxu1 }
 0x1b5   :  { %v254_v23 = vadd.f32 %v476_v19, %v253_v22  ;;  %v263_v25 = vmax.f32 %v259_v21, 0.0 }
 0x1b7   :  { %v262_v24 = vmax.f32 %v254_v23, 0.0 }
 0x1b9   :  { %533 = vmatprep.mubr.msk.f32.mxu0 %vm180_vm1, %v262_v24 }
 0x1ba   :  { %534 = vmatmul.mubr.msk.f32.vlgmr.msra.gmra.mxu0 %vm180_vm1, %v263_v25 }
 0x27a   :  { %v535_v31 = vpop.f32.mrf.mxu0 }
 0x27b   :  { %v353_v32 = vadd.f32 %v535_v31, %v479_v30 }
 0x27c   :  { %v347_v33 = vpop.f32.mrf.mxu0 }
 0x27d   :  { %v348_v34 = vadd.f32 %v479_v30, %v347_v33  ;;  %v357_v36 = vmax.f32 %v353_v32, 0.0 }
 0x27f   :  { %v356_v35 = vmax.f32 %v348_v34, 0.0 }
 0x281   :  { %544 = vmatprep.mubr.msk.f32.mxu1 %vm180_vm1, %v356_v35 }
 0x282   :  { %545 = vmatmul.mubr.msk.f32.vlgmr.msra.gmra.mxu1 %vm180_vm1, %v357_v36 }
 0x342   :  { %v546_v38 = vpop.f32.mrf.mxu1 }
 0x343   :  { %v447_v39 = vadd.f32 %v546_v38, %v482_v37 }
 0x344   :  { %v441_v40 = vpop.f32.mrf.mxu1 }
 0x345   :  { %v451_v41 = vmax.f32 %v447_v39, 0.0  ;;  %v442_v42 = vadd.f32 %v482_v37, %v441_v40 }
 0x347   :  { %v450_v43 = vmax.f32 %v442_v42, 0.0  ;;  %454 = vst.msk [vmem:[#allocation8 + $0x8] sm:$0xff] %vm452_vm2, %v451_v41 }
 0x349   :  { %453 = vst.msk [vmem:[#allocation8] sm:$0xff] %vm452_vm2, %v450_v43 }
 0x34a   :  { %624 = shalt.err (!%p621_p5)
}
 0x34b   :  { %466 = dma.vmem_to_hbm [thread:$0]  %s461_s6, 256, %s770_s9, [#allocation4], %s641_s14, %s641_s14, %s642_s15  }
 0x34c   :  { %637 = dma.done.wait [#allocation4], 256  }
 0x34d   :  { %638 = vsyncadd [#allocation4], 4294967040 }
 0x34e   :  { %470 = vsyncpa [#allocation3], 1 }
 0x34f   :  { %471 = vsyncpa [#allocation6], 1 }
 0x350   :  { %472 = vsyncpa [#allocation4], 1 }

</bundles_post_ra>
